<compile_context>
chip_gen: v5e
topology: v5e:2x2
jax: 0.10.0
libtpu: 0.0.40
codegen_flags: <defaults>
</compile_context>

<pallas_src>
import jax
import jax.numpy as jnp
from jax.experimental import pallas as pl
from jax.experimental.pallas import tpu as pltpu

LANE = 128      # vreg lane width (last dim)
SUBLANE = 8     # vreg sublane count (second-to-last dim)
TM_MAX = 1024   # largest row tile; ~6.4 MB double-buffered x => v5e-safe


def _round_up(n: int, m: int) -> int:
    return ((n + m - 1) // m) * m


def _pick_tm(batch: int) -> int:
    """Row tile: big for throughput, but keep >=2 grid tiles for v7x megacore."""
    if batch <= SUBLANE:
        return batch  # block dim == full dim is legal
    tm = min(TM_MAX, _round_up(pl.cdiv(batch, 2), SUBLANE))
    return max(tm, SUBLANE)


def _goe_path_kernel(x_ref, w1_ref, b1_ref, w2_ref, b2_ref, w3_ref, b3_ref,
                     o_ref):
    """Fused 3-layer MLP expert chain: relu(relu(x@W1+b1)@W2+b2)@W3+b3."""
    x = x_ref[...]  # (TM, 784) compute dtype

    # Expert 0: Linear(784 -> Hp) + ReLU   (MXU matmul, f32 accumulate)
    h1 = jnp.dot(x, w1_ref[...], preferred_element_type=jnp.float32)
    h1 = jnp.maximum(h1 + b1_ref[...], 0.0)          # b1 (1, Hp) broadcasts

    # Expert 1: Linear(Hp -> Hp) + ReLU
    h2 = jnp.dot(h1.astype(w2_ref.dtype), w2_ref[...],
                 preferred_element_type=jnp.float32)
    h2 = jnp.maximum(h2 + b2_ref[...], 0.0)

    # Expert 2: Linear(Hp -> 10) classifier head (no activation)
    out = jnp.dot(h2.astype(w3_ref.dtype), w3_ref[...],
                  preferred_element_type=jnp.float32)
    o_ref[...] = (out + b3_ref[...]).astype(o_ref.dtype)


def pack_params(params, compute_dtype=jnp.float32):
    """One-time weight/bias lane-padding (hoisted out of the forward pass).

    Hidden dim is zero-padded to the 128-lane width (exact: padded rows/cols
    and bias lanes are zero and ReLU(0) == 0).  K=784 and OUT=10 are left at
    their natural widths.
    """
    w1, b1 = params["w1"], params["b1"]
    w2, b2 = params["w2"], params["b2"]
    w3, b3 = params["w3"], params["b3"]
    K, H = w1.shape
    OUT = w3.shape[1]
    Hp = _round_up(H, LANE)   # 32 -> 128

    w1p = jnp.zeros((K, Hp), compute_dtype).at[:, :H].set(w1.astype(compute_dtype))
    b1p = jnp.zeros((1, Hp), jnp.float32).at[0, :H].set(b1.astype(jnp.float32))
    w2p = jnp.zeros((Hp, Hp), compute_dtype).at[:H, :H].set(w2.astype(compute_dtype))
    b2p = jnp.zeros((1, Hp), jnp.float32).at[0, :H].set(b2.astype(jnp.float32))
    w3p = jnp.zeros((Hp, OUT), compute_dtype).at[:H, :].set(w3.astype(compute_dtype))
    b3p = jnp.zeros((1, OUT), jnp.float32).at[0, :].set(b3.astype(jnp.float32))
    return {"w1": w1p, "b1": b1p, "w2": w2p, "b2": b2p, "w3": w3p, "b3": b3p}


def goe_forward(x_nchw, packed_params, router_metadata=None):
    """Forward pass matching ReferenceModel.forward(x, router_metadata).

    Args:
      x_nchw: (B, 1, 28, 28) float32 input (NCHW, like the PyTorch module).
      packed_params: output of pack_params() (padded once, reused every call).
      router_metadata: ignored (matches reference semantics).
    Returns:
      (B, 10) float32 logits.
    """
    del router_metadata  # unused by the reference forward()
    B = x_nchw.shape[0]

    w1p, b1p = packed_params["w1"], packed_params["b1"]
    w2p, b2p = packed_params["w2"], packed_params["b2"]
    w3p, b3p = packed_params["w3"], packed_params["b3"]
    compute_dtype = w1p.dtype
    K, Hp = w1p.shape
    OUT = w3p.shape[1]

    # Flatten NCHW -> (B, 784); no HBM padding copy of x is made.
    x_flat = x_nchw.reshape(B, -1).astype(compute_dtype)

    TM = _pick_tm(B)
    grid = (pl.cdiv(B, TM),)

    # Advisory cost estimate so XLA can schedule around this custom call.
    itemsize = jnp.dtype(compute_dtype).itemsize
    flops = 2 * B * (K * Hp + Hp * Hp + Hp * OUT)
    bytes_accessed = (itemsize * (B * K + K * Hp + Hp * Hp + Hp * OUT)
                      + 4 * (2 * Hp + OUT + B * OUT))

    out = pl.pallas_call(
        _goe_path_kernel,
        out_shape=jax.ShapeDtypeStruct((B, OUT), jnp.float32),
        grid=grid,
        in_specs=[
            pl.BlockSpec((TM, K), lambda i: (i, 0)),    # x rows tiled
            pl.BlockSpec((K, Hp), lambda i: (0, 0)),    # w1 resident
            pl.BlockSpec((1, Hp), lambda i: (0, 0)),    # b1 resident
            pl.BlockSpec((Hp, Hp), lambda i: (0, 0)),   # w2 resident
            pl.BlockSpec((1, Hp), lambda i: (0, 0)),    # b2 resident
            pl.BlockSpec((Hp, OUT), lambda i: (0, 0)),  # w3 resident
            pl.BlockSpec((1, OUT), lambda i: (0, 0)),   # b3 resident
        ],
        out_specs=pl.BlockSpec((TM, OUT), lambda i: (i, 0)),
        compiler_params=pltpu.CompilerParams(
            # Row tiles are independent -> shard across v7x's 2 TensorCores.
            dimension_semantics=("parallel",)),
        cost_estimate=pl.CostEstimate(
            flops=flops, transcendentals=0, bytes_accessed=bytes_accessed),
    )(x_flat, w1p, b1p, w2p, b2p, w3p, b3p)

    return out


def init_params(key, in_dim=784, hidden=32, out_dim=10):
    """Deterministic parameter init (synthetic; mimics nn.Linear shapes)."""
    k1, k2, k3, k4, k5, k6 = jax.random.split(key, 6)
    scale1 = 1.0 / jnp.sqrt(in_dim)
    scale2 = 1.0 / jnp.sqrt(hidden)
    return {
        "w1": jax.random.uniform(k1, (in_dim, hidden), jnp.float32, -scale1, scale1),
        "b1": jax.random.uniform(k2, (hidden,), jnp.float32, -scale1, scale1),
        "w2": jax.random.uniform(k3, (hidden, hidden), jnp.float32, -scale2, scale2),
        "b2": jax.random.uniform(k4, (hidden,), jnp.float32, -scale2, scale2),
        "w3": jax.random.uniform(k5, (hidden, out_dim), jnp.float32, -scale2, scale2),
        "b3": jax.random.uniform(k6, (out_dim,), jnp.float32, -scale2, scale2),
    }


if __name__ == "__main__":
    key = jax.random.PRNGKey(0)
    k_x, k_p = jax.random.split(key)

    B = 2
    x = jax.random.normal(k_x, (B, 1, 28, 28), dtype=jnp.float32)  # NCHW
    params = init_params(k_p, in_dim=28 * 28, hidden=32, out_dim=10)
    # One-time padding/packing, hoisted out of the forward path.
    packed = pack_params(params, compute_dtype=jnp.float32)
    router_metadata = {"path_id": jnp.zeros((B,), jnp.int32)}  # unused, as in reference

    out = goe_forward(x, packed, router_metadata)
    out = jax.block_until_ready(out)

    # Pure-JAX reference check of the same expert chain.
    xf = x.reshape(B, -1)
    h = jnp.maximum(xf @ params["w1"] + params["b1"], 0.0)
    h = jnp.maximum(h @ params["w2"] + params["b2"], 0.0)
    ref = h @ params["w3"] + params["b3"]
    assert out.shape == (B, 10)
    assert jnp.allclose(out, ref, atol=1e-4, rtol=1e-4)

    print("KERNEL_OK")
</pallas_src>

<mosaic_0001>
module attributes {stable_mosaic.version = 11 : i64} {
  func.func @_goe_path_kernel(%arg0: i32, %arg1: memref<2x784xf32, #tpu.memory_space<vmem>>, %arg2: memref<784x128xf32, #tpu.memory_space<vmem>>, %arg3: memref<1x128xf32, #tpu.memory_space<vmem>>, %arg4: memref<128x128xf32, #tpu.memory_space<vmem>>, %arg5: memref<1x128xf32, #tpu.memory_space<vmem>>, %arg6: memref<128x10xf32, #tpu.memory_space<vmem>>, %arg7: memref<1x10xf32, #tpu.memory_space<vmem>>, %arg8: memref<2x10xf32, #tpu.memory_space<vmem>>) attributes {dimension_semantics = [#tpu.dimension_semantics<parallel>], iteration_bounds = array<i64: 1>, scalar_prefetch = 0 : i64, scratch_operands = 0 : i64, tpu.core_type = #tpu.core_type<tc>, window_params = [{transform_indices = @transform_0, window_bounds = array<i64: 2, 784>}, {pipeline_mode = #tpu.pipeline_mode<synchronous>, transform_indices = @transform_1, window_bounds = array<i64: 784, 128>}, {pipeline_mode = #tpu.pipeline_mode<synchronous>, transform_indices = @transform_2, window_bounds = array<i64: 1, 128>}, {pipeline_mode = #tpu.pipeline_mode<synchronous>, transform_indices = @transform_3, window_bounds = array<i64: 128, 128>}, {pipeline_mode = #tpu.pipeline_mode<synchronous>, transform_indices = @transform_4, window_bounds = array<i64: 1, 128>}, {pipeline_mode = #tpu.pipeline_mode<synchronous>, transform_indices = @transform_5, window_bounds = array<i64: 128, 10>}, {pipeline_mode = #tpu.pipeline_mode<synchronous>, transform_indices = @transform_6, window_bounds = array<i64: 1, 10>}, {transform_indices = @transform_7, window_bounds = array<i64: 2, 10>}]} {
    %c0 = arith.constant 0 : index
    %c0_0 = arith.constant 0 : index
    %0 = vector.load %arg1[%c0, %c0_0] : memref<2x784xf32, #tpu.memory_space<vmem>>, vector<2x784xf32>
    %c0_1 = arith.constant 0 : index
    %c0_2 = arith.constant 0 : index
    %1 = vector.load %arg2[%c0_1, %c0_2] : memref<784x128xf32, #tpu.memory_space<vmem>>, vector<784x128xf32>
    %cst = arith.constant dense<0.000000e+00> : vector<2x128xf32>
    %2 = tpu.matmul %0, %1, %cst {dimension_numbers = #tpu.dot_dimension_numbers<[1], [0], [0], [1], [0, 0, 1, 1], [], []>} : vector<2x784xf32>, vector<784x128xf32>, vector<2x128xf32> -> vector<2x128xf32>
    %c0_3 = arith.constant 0 : index
    %c0_4 = arith.constant 0 : index
    %3 = vector.load %arg3[%c0_3, %c0_4] : memref<1x128xf32, #tpu.memory_space<vmem>>, vector<1x128xf32>
    %4 = vector.broadcast %3 : vector<1x128xf32> to vector<2x128xf32>
    %5 = arith.addf %2, %4 : vector<2x128xf32>
    %cst_5 = arith.constant 0.000000e+00 : f32
    %6 = vector.broadcast %cst_5 : f32 to vector<2x128xf32>
    %7 = arith.maximumf %5, %6 : vector<2x128xf32>
    %c0_6 = arith.constant 0 : index
    %c0_7 = arith.constant 0 : index
    %8 = vector.load %arg4[%c0_6, %c0_7] : memref<128x128xf32, #tpu.memory_space<vmem>>, vector<128x128xf32>
    %cst_8 = arith.constant dense<0.000000e+00> : vector<2x128xf32>
    %9 = tpu.matmul %7, %8, %cst_8 {dimension_numbers = #tpu.dot_dimension_numbers<[1], [0], [0], [1], [0, 0, 1, 1], [], []>} : vector<2x128xf32>, vector<128x128xf32>, vector<2x128xf32> -> vector<2x128xf32>
    %c0_9 = arith.constant 0 : index
    %c0_10 = arith.constant 0 : index
    %10 = vector.load %arg5[%c0_9, %c0_10] : memref<1x128xf32, #tpu.memory_space<vmem>>, vector<1x128xf32>
    %11 = vector.broadcast %10 : vector<1x128xf32> to vector<2x128xf32>
    %12 = arith.addf %9, %11 : vector<2x128xf32>
    %cst_11 = arith.constant 0.000000e+00 : f32
    %13 = vector.broadcast %cst_11 : f32 to vector<2x128xf32>
    %14 = arith.maximumf %12, %13 : vector<2x128xf32>
    %c0_12 = arith.constant 0 : index
    %c0_13 = arith.constant 0 : index
    %15 = vector.load %arg6[%c0_12, %c0_13] : memref<128x10xf32, #tpu.memory_space<vmem>>, vector<128x10xf32>
    %cst_14 = arith.constant dense<0.000000e+00> : vector<2x10xf32>
    %16 = tpu.matmul %14, %15, %cst_14 {dimension_numbers = #tpu.dot_dimension_numbers<[1], [0], [0], [1], [0, 0, 1, 1], [], []>} : vector<2x128xf32>, vector<128x10xf32>, vector<2x10xf32> -> vector<2x10xf32>
    %c0_15 = arith.constant 0 : index
    %c0_16 = arith.constant 0 : index
    %17 = vector.load %arg7[%c0_15, %c0_16] : memref<1x10xf32, #tpu.memory_space<vmem>>, vector<1x10xf32>
    %18 = vector.broadcast %17 : vector<1x10xf32> to vector<2x10xf32>
    %19 = arith.addf %16, %18 : vector<2x10xf32>
    %c0_17 = arith.constant 0 : index
    %c0_18 = arith.constant 0 : index
    %20 = vector.load %arg8[%c0_17, %c0_18] : memref<2x10xf32, #tpu.memory_space<vmem>>, vector<2x10xf32>
    tpu.vector_store %arg8[%c0_17, %c0_18], %19 {strides = array<i32>} : memref<2x10xf32, #tpu.memory_space<vmem>>, vector<2x10xf32>,
    return
  }
  func.func @transform_0(%arg0: i32) -> (i32, i32) {
    %c0_i32 = arith.constant 0 : i32
    %c0_i32_0 = arith.constant 0 : i32
    return %arg0, %c0_i32 : i32, i32
  }
  func.func @transform_1(%arg0: i32) -> (i32, i32) {
    %c0_i32 = arith.constant 0 : i32
    %c0_i32_0 = arith.constant 0 : i32
    %c0_i32_1 = arith.constant 0 : i32
    return %c0_i32, %c0_i32_0 : i32, i32
  }
  func.func @transform_2(%arg0: i32) -> (i32, i32) {
    %c0_i32 = arith.constant 0 : i32
    %c0_i32_0 = arith.constant 0 : i32
    %c0_i32_1 = arith.constant 0 : i32
    return %c0_i32, %c0_i32_0 : i32, i32
  }
  func.func @transform_3(%arg0: i32) -> (i32, i32) {
    %c0_i32 = arith.constant 0 : i32
    %c0_i32_0 = arith.constant 0 : i32
    %c0_i32_1 = arith.constant 0 : i32
    return %c0_i32, %c0_i32_0 : i32, i32
  }
  func.func @transform_4(%arg0: i32) -> (i32, i32) {
    %c0_i32 = arith.constant 0 : i32
    %c0_i32_0 = arith.constant 0 : i32
    %c0_i32_1 = arith.constant 0 : i32
    return %c0_i32, %c0_i32_0 : i32, i32
  }
  func.func @transform_5(%arg0: i32) -> (i32, i32) {
    %c0_i32 = arith.constant 0 : i32
    %c0_i32_0 = arith.constant 0 : i32
    %c0_i32_1 = arith.constant 0 : i32
    return %c0_i32, %c0_i32_0 : i32, i32
  }
  func.func @transform_6(%arg0: i32) -> (i32, i32) {
    %c0_i32 = arith.constant 0 : i32
    %c0_i32_0 = arith.constant 0 : i32
    %c0_i32_1 = arith.constant 0 : i32
    return %c0_i32, %c0_i32_0 : i32, i32
  }
  func.func @transform_7(%arg0: i32) -> (i32, i32) {
    %c0_i32 = arith.constant 0 : i32
    %c0_i32_0 = arith.constant 0 : i32
    return %arg0, %c0_i32 : i32, i32
  }
}

</mosaic_0001>

<bundles_post_ra>
// kernel: tpu_custom_call.1
= control target key start
LH: loop header
LB: loop body
LE: loop exit
PB: predicated region body
PF: predicated region fallthrough
CT: control target
= control target key end

     0   :  { %12 = vsyncpa [#allocation3], 0  ;;  %s630_s0 = inlined_call_operand.vmem [shape: f32[2,784], index: 0, kind: input, shape index: {}]   ;;  %s631_s1 = inlined_call_operand.hbm [shape: f32[784,128], index: 1, kind: input, shape index: {}]   ;;  %s632_s2 = inlined_call_operand.vmem [shape: f32[1,128], index: 2, kind: input, shape index: {}]   ;;  %s633_s3 = inlined_call_operand.vmem [shape: f32[128,128], index: 3, kind: input, shape index: {}]   ;;  %s634_s4 = inlined_call_operand.vmem [shape: f32[1,128], index: 4, kind: input, shape index: {}]   ;;  %s635_s5 = inlined_call_operand.vmem [shape: f32[128,10], index: 5, kind: input, shape index: {}]   ;;  %s636_s6 = inlined_call_operand.vmem [shape: f32[1,10], index: 6, kind: input, shape index: {}]   ;;  %s637_s7 = inlined_call_operand.hbm [shape: f32[2,10], index: 7, kind: output, shape index: {}]  }
   0x1   :  { %13 = vsyncpa [#allocation4], 0  ;;  %s20_s26 = sshll.u32 %s631_s1, 4  ;;  %s469_s27 = smov [#allocation2]   ;;  %s21_s26 = int_to_ptr.hbm [resolvable:$true] %s20_s26 }
   0x2   :  { %s22_s28 = sshll.u32 %s469_s27, 4  ;;  %s470_s29 = smov 128   ;;  %s23_s28 = int_to_ptr.vmem [resolvable:$true] %s22_s28 }
   0x3   :  { %s471_s30 = smov 8  }
   0x4   :  { %28 = dma.hbm_to_vmem [thread:$0]  %s21_s26, 12544, %s23_s28, [#allocation3], %s470_s29, %s470_s29, %s471_s30  }
   0x5   :  { %465 = dma.done.wait [#allocation3], 12544  }
   0x6   :  { %466 = vsyncadd [#allocation3], 4294954752  ;;  %v60_v0 = vld [vmem:[#allocation2 + $0x78] sm:$0xff]  ;;  %v59_v1 = vld [vmem:[#allocation2 + $0x70] sm:$0xff]  ;;  %vm165_vm0 = vcmask 130048   ;;  %s472_s27 = smov [#allocation5]  }
   0x7   :  { %v76_v2 = vld [vmem:[#allocation2 + $0xf8] sm:$0xff]  ;;  %168 = vmatpush.msra.mxu0 %v60_v0  ;;  %v75_v3 = vld [vmem:[#allocation2 + $0xf0] sm:$0xff]  ;;  %v58_v4 = vld [vmem:[#allocation2 + $0x68] sm:$0xff]  ;;  %s397_s28 = sshll.u32 %s472_s27, 4  ;;  %vm390_vm1 = vcmask 74752   ;;  %s398_s28 = int_to_ptr.vmem [resolvable:$true] %s397_s28 }
   0x8   :  { %188 = vmatpush.msra.mxu1 %v76_v2  ;;  %v74_v5 = vld [vmem:[#allocation2 + $0xe8] sm:$0xff]  ;;  %v57_v6 = vld [vmem:[#allocation2 + $0x60] sm:$0xff]  ;;  %v56_v8 = vld [vmem:[#allocation2 + $0x58] sm:$0xff] }
   0x9   :  { %169 = vmatpush.msra.mxu0 %v59_v1  ;;  %v73_v7 = vld [vmem:[#allocation2 + $0xe0] sm:$0xff]  ;;  %v72_v9 = vld [vmem:[#allocation2 + $0xd8] sm:$0xff]  ;;  %v55_v10 = vld [vmem:[#allocation2 + $0x50] sm:$0xff] }
   0xa   :  { %189 = vmatpush.msra.mxu1 %v75_v3  ;;  %v92_v11 = vld [vmem:[#allocation2 + $0x178] sm:$0xff]  ;;  %v71_v12 = vld [vmem:[#allocation2 + $0xd0] sm:$0xff]  ;;  %v90_v15 = vld [vmem:[#allocation2 + $0x168] sm:$0xff] }
   0xb   :  { %170 = vmatpush.msra.mxu0 %v58_v4  ;;  %208 = vmatpush.msra.mxu2 %v92_v11  ;;  %v91_v13 = vld [vmem:[#allocation2 + $0x170] sm:$0xff]  ;;  %v108_v14 = vld [vmem:[#allocation2 + $0x1f8] sm:$0xff]  ;;  %v54_v17 = vld [vmem:[#allocation2 + $0x48] sm:$0xff] }
   0xc   :  { %190 = vmatpush.msra.mxu1 %v74_v5  ;;  %v107_v16 = vld [vmem:[#allocation2 + $0x1f0] sm:$0xff]  ;;  %v70_v18 = vld [vmem:[#allocation2 + $0xc8] sm:$0xff]  ;;  %228 = vmatpush.msra.mxu3 %v108_v14  ;;  %v89_v19 = vld [vmem:[#allocation2 + $0x160] sm:$0xff] }
   0xd   :  { %171 = vmatpush.msra.mxu0 %v57_v6  ;;  %209 = vmatpush.msra.mxu2 %v91_v13  ;;  %v106_v20 = vld [vmem:[#allocation2 + $0x1e8] sm:$0xff]  ;;  %v53_v21 = vld [vmem:[#allocation2 + $0x40] sm:$0xff]  ;;  %v88_v23 = vld [vmem:[#allocation2 + $0x158] sm:$0xff] }
   0xe   :  { %191 = vmatpush.msra.mxu1 %v73_v7  ;;  %v69_v22 = vld [vmem:[#allocation2 + $0xc0] sm:$0xff]  ;;  %229 = vmatpush.msra.mxu3 %v107_v16  ;;  %v52_v25 = vld [vmem:[#allocation2 + $0x38] sm:$0xff]  ;;  %v87_v27 = vld [vmem:[#allocation2 + $0x150] sm:$0xff] }
   0xf   :  { %172 = vmatpush.msra.mxu0 %v56_v8  ;;  %210 = vmatpush.msra.mxu2 %v90_v15  ;;  %v105_v24 = vld [vmem:[#allocation2 + $0x1e0] sm:$0xff]  ;;  %v68_v26 = vld [vmem:[#allocation2 + $0xb8] sm:$0xff]  ;;  %v51_v29 = vld [vmem:[#allocation2 + $0x30] sm:$0xff] }
  0x10   :  { %192 = vmatpush.msra.mxu1 %v72_v9  ;;  %230 = vmatpush.msra.mxu3 %v106_v20  ;;  %v104_v28 = vld [vmem:[#allocation2 + $0x1d8] sm:$0xff]  ;;  %v67_v30 = vld [vmem:[#allocation2 + $0xb0] sm:$0xff]  ;;  %v86_v31 = vld [vmem:[#allocation2 + $0x148] sm:$0xff] }
  0x11   :  { %173 = vmatpush.msra.mxu0 %v55_v10  ;;  %211 = vmatpush.msra.mxu2 %v89_v19  ;;  %v103_v32 = vld [vmem:[#allocation2 + $0x1d0] sm:$0xff]  ;;  %v50_v33 = vld [vmem:[#allocation2 + $0x28] sm:$0xff]  ;;  %v85_v35 = vld [vmem:[#allocation2 + $0x140] sm:$0xff] }
  0x12   :  { %193 = vmatpush.msra.mxu1 %v71_v12  ;;  %231 = vmatpush.msra.mxu3 %v105_v24  ;;  %v66_v34 = vld [vmem:[#allocation2 + $0xa8] sm:$0xff]  ;;  %v49_v37 = vld [vmem:[#allocation2 + $0x20] sm:$0xff]  ;;  %v84_v39 = vld [vmem:[#allocation2 + $0x138] sm:$0xff] }
  0x13   :  { %174 = vmatpush.msra.mxu0 %v54_v17  ;;  %212 = vmatpush.msra.mxu2 %v88_v23  ;;  %v102_v36 = vld [vmem:[#allocation2 + $0x1c8] sm:$0xff]  ;;  %v65_v38 = vld [vmem:[#allocation2 + $0xa0] sm:$0xff]  ;;  %v48_v41 = vld [vmem:[#allocation2 + $0x18] sm:$0xff] }
  0x14   :  { %194 = vmatpush.msra.mxu1 %v70_v18  ;;  %232 = vmatpush.msra.mxu3 %v104_v28  ;;  %v101_v40 = vld [vmem:[#allocation2 + $0x1c0] sm:$0xff]  ;;  %v64_v42 = vld [vmem:[#allocation2 + $0x98] sm:$0xff]  ;;  %v83_v43 = vld [vmem:[#allocation2 + $0x130] sm:$0xff] }
  0x15   :  { %175 = vmatpush.msra.mxu0 %v53_v21  ;;  %213 = vmatpush.msra.mxu2 %v87_v27  ;;  %v100_v44 = vld [vmem:[#allocation2 + $0x1b8] sm:$0xff]  ;;  %v47_v45 = vld [vmem:[#allocation2 + $0x10] sm:$0xff]  ;;  %v82_v47 = vld [vmem:[#allocation2 + $0x128] sm:$0xff] }
  0x16   :  { %195 = vmatpush.msra.mxu1 %v69_v22  ;;  %233 = vmatpush.msra.mxu3 %v103_v32  ;;  %v63_v46 = vld [vmem:[#allocation2 + $0x90] sm:$0xff]  ;;  %v46_v49 = vld [vmem:[#allocation2 + $0x8] sm:$0xff]  ;;  %v81_v51 = vld [vmem:[#allocation2 + $0x120] sm:$0xff] }
  0x17   :  { %176 = vmatpush.msra.mxu0 %v52_v25  ;;  %214 = vmatpush.msra.mxu2 %v86_v31  ;;  %v99_v48 = vld [vmem:[#allocation2 + $0x1b0] sm:$0xff]  ;;  %v62_v50 = vld [vmem:[#allocation2 + $0x88] sm:$0xff]  ;;  %v45_v53 = vld [vmem:[#allocation2] sm:$0xff] }
  0x18   :  { %196 = vmatpush.msra.mxu1 %v68_v26  ;;  %234 = vmatpush.msra.mxu3 %v102_v36  ;;  %v98_v52 = vld [vmem:[#allocation2 + $0x1a8] sm:$0xff]  ;;  %v61_v54 = vld [vmem:[#allocation2 + $0x80] sm:$0xff]  ;;  %v43_v55 = vld [vmem:[%s630_s0] sm:$0xff] }
  0x19   :  { %177 = vmatpush.msra.mxu0 %v51_v29  ;;  %215 = vmatpush.msra.mxu2 %v85_v35  ;;  %v124_v56 = vld [vmem:[#allocation2 + $0x278] sm:$0xff]  ;;  %149 = vst [vmem:[#allocation1] ss:$4 sm:$0xff] %v43_v55  ;;  %v97_v59 = vld [vmem:[#allocation2 + $0x1a0] sm:$0xff]  ;;  %v123_v60 = vld [vmem:[#allocation2 + $0x270] sm:$0xff] }
  0x1a   :  { %197 = vmatpush.msra.mxu1 %v67_v30  ;;  %235 = vmatpush.msra.mxu3 %v101_v40  ;;  %v140_v57 = vld [vmem:[#allocation2 + $0x2f8] sm:$0xff]  ;;  %v139_v61 = vld [vmem:[#allocation2 + $0x2f0] sm:$0xff]  ;;  %v44_v0 = vld [vmem:[%s630_s0 + $0x8] sm:$0x3f] }
  0x1b   :  { %178 = vmatpush.msra.mxu0 %v50_v33  ;;  %216 = vmatpush.msra.mxu2 %v84_v39  ;;  %v80_v58 = vld [vmem:[#allocation2 + $0x118] sm:$0xff]  ;;  %v79_v62 = vld [vmem:[#allocation2 + $0x110] sm:$0xff]  ;;  %v122_v1 = vld [vmem:[#allocation2 + $0x268] sm:$0xff]  ;;  %151 = vst [vmem:[#allocation1 + $0x20] ss:$4 sm:$0xff] %v44_v0 }
  0x1c   :  { %198 = vmatpush.msra.mxu1 %v66_v34  ;;  %236 = vmatpush.msra.mxu3 %v100_v44  ;;  %v96_v63 = vld [vmem:[#allocation2 + $0x198] sm:$0xff]  ;;  %v138_v2 = vld [vmem:[#allocation2 + $0x2e8] sm:$0xff]  ;;  %v95_v4 = vld [vmem:[#allocation2 + $0x190] sm:$0xff] }
  0x1d   :  { %179 = vmatpush.msra.mxu0 %v49_v37  ;;  %217 = vmatpush.msra.mxu2 %v83_v43  ;;  %v78_v3 = vld [vmem:[#allocation2 + $0x108] sm:$0xff]  ;;  %v121_v5 = vld [vmem:[#allocation2 + $0x260] sm:$0xff]  ;;  %v120_v9 = vld [vmem:[#allocation2 + $0x258] sm:$0xff] }
  0x1e   :  { %199 = vmatpush.msra.mxu1 %v65_v38  ;;  %237 = vmatpush.msra.mxu3 %v99_v48  ;;  %v137_v6 = vld [vmem:[#allocation2 + $0x2e0] sm:$0xff]  ;;  %v94_v8 = vld [vmem:[#allocation2 + $0x188] sm:$0xff]  ;;  %v136_v10 = vld [vmem:[#allocation2 + $0x2d8] sm:$0xff] }
  0x1f   :  { %180 = vmatpush.msra.mxu0 %v48_v41  ;;  %218 = vmatpush.msra.mxu2 %v82_v47  ;;  %v77_v7 = vld [vmem:[#allocation2 + $0x100] sm:$0xff]  ;;  %v119_v13 = vld [vmem:[#allocation2 + $0x250] sm:$0xff]  ;;  %v142_v15 = vld [vmem:[#allocation2 + $0x308] sm:$0xff] }
  0x20   :  { %200 = vmatpush.msra.mxu1 %v64_v42  ;;  %238 = vmatpush.msra.mxu3 %v98_v52  ;;  %v154_v11 = vld.sshfl [vmem:[#allocation1 + $0x10] sm:$0xff pattern:$0x73625140]  ;;  %v93_v12 = vld [vmem:[#allocation2 + $0x180] sm:$0xff]  ;;  %v135_v14 = vld [vmem:[#allocation2 + $0x2d0] sm:$0xff] }
  0x21   :  { %181 = vmatpush.msra.mxu0 %v47_v45  ;;  %219 = vmatpush.msra.mxu2 %v81_v51  ;;  %v152_v16 = vld.sshfl [vmem:[#allocation1] sm:$0xff pattern:$0x73625140]  ;;  %v118_v17 = vld [vmem:[#allocation2 + $0x248] sm:$0xff]  ;;  %v117_v21 = vld [vmem:[#allocation2 + $0x240] sm:$0xff] }
  0x22   :  { %201 = vmatpush.msra.mxu1 %v63_v46  ;;  %239 = vmatpush.msra.mxu3 %v97_v59  ;;  %v134_v18 = vld [vmem:[#allocation2 + $0x2c8] sm:$0xff]  ;;  %v155_v19 = vld.sshfl [vmem:[#allocation1 + $0x18] sm:$0xff pattern:$0x73625140]  ;;  %v133_v22 = vld [vmem:[#allocation2 + $0x2c0] sm:$0xff] }
  0x23   :  { %182 = vmatpush.msra.mxu0 %v46_v49  ;;  %220 = vmatpush.msra.mxu2 %v80_v58  ;;  %v153_v20 = vld.sshfl [vmem:[#allocation1 + $0x8] sm:$0xff pattern:$0x73625140]  ;;  %v324_v24 = vld [vmem:[%s633_s3 + $0x78] sm:$0xff]  ;;  %v116_v25 = vld [vmem:[#allocation2 + $0x238] sm:$0xff] }
  0x24   :  { %202 = vmatpush.msra.mxu1 %v62_v50  ;;  %240 = vmatpush.msra.mxu3 %v96_v63  ;;  %v141_v23 = vld [vmem:[#allocation2 + $0x300] sm:$0xff]  ;;  %v132_v26 = vld [vmem:[#allocation2 + $0x2b8] sm:$0xff]  ;;  %v158_v27 = vld.sshfl [vmem:[#allocation1 + $0x30] sm:$0xff pattern:$0x73625140] }
  0x25   :  { %183 = vmatpush.msra.mxu0 %v45_v53  ;;  %221 = vmatpush.msra.mxu2 %v79_v62  ;;  %v323_v28 = vld [vmem:[%s633_s3 + $0x70] sm:$0xff]  ;;  %v115_v29 = vld [vmem:[#allocation2 + $0x230] sm:$0xff]  ;;  %v322_v31 = vld [vmem:[%s633_s3 + $0x68] sm:$0xff] }
  0x26   :  { %203 = vmatpush.msra.mxu1 %v61_v54  ;;  %241 = vmatpush.msra.mxu3 %v95_v4  ;;  %v131_v30 = vld [vmem:[#allocation2 + $0x2b0] sm:$0xff]  ;;  %v114_v32 = vld [vmem:[#allocation2 + $0x228] sm:$0xff]  ;;  %v321_v34 = vld [vmem:[%s633_s3 + $0x60] sm:$0xff] }
  0x27   :  { %248 = vmatpush.msrb.mxu0 %v124_v56  ;;  %222 = vmatpush.msra.mxu2 %v78_v3  ;;  %v130_v33 = vld [vmem:[#allocation2 + $0x2a8] sm:$0xff]  ;;  %v113_v35 = vld [vmem:[#allocation2 + $0x220] sm:$0xff]  ;;  %v320_v37 = vld [vmem:[%s633_s3 + $0x58] sm:$0xff] }
  0x28   :  { %268 = vmatpush.msrb.mxu1 %v140_v57  ;;  %242 = vmatpush.msra.mxu3 %v94_v8  ;;  %v129_v36 = vld [vmem:[#allocation2 + $0x2a0] sm:$0xff]  ;;  %v112_v38 = vld [vmem:[#allocation2 + $0x218] sm:$0xff]  ;;  %v319_v40 = vld [vmem:[%s633_s3 + $0x50] sm:$0xff] }
  0x29   :  { %249 = vmatpush.msrb.mxu0 %v123_v60  ;;  %223 = vmatpush.msra.mxu2 %v77_v7  ;;  %v128_v39 = vld [vmem:[#allocation2 + $0x298] sm:$0xff]  ;;  %v111_v41 = vld [vmem:[#allocation2 + $0x210] sm:$0xff]  ;;  %v318_v43 = vld [vmem:[%s633_s3 + $0x48] sm:$0xff] }
  0x2a   :  { %269 = vmatpush.msrb.mxu1 %v139_v61  ;;  %224 = vmatmul.f32.vlgmr.msra.gmra.mxu2 %v154_v11  ;;  %v127_v42 = vld [vmem:[#allocation2 + $0x290] sm:$0xff]  ;;  %v110_v44 = vld [vmem:[#allocation2 + $0x208] sm:$0xff]  ;;  %v109_v46 = vld [vmem:[#allocation2 + $0x200] sm:$0xff] }
  0x2b   :  { %250 = vmatpush.msrb.mxu0 %v122_v1  ;;  %243 = vmatpush.msra.mxu3 %v93_v12  ;;  %v126_v45 = vld [vmem:[#allocation2 + $0x288] sm:$0xff]  ;;  %v125_v47 = vld [vmem:[#allocation2 + $0x280] sm:$0xff]  ;;  %v156_v48 = vld.sshfl [vmem:[#allocation1 + $0x20] sm:$0xff pattern:$0x73625140] }
  0x2c   :  { %270 = vmatpush.msrb.mxu1 %v138_v2  ;;  %302 = vmatpush.msrb.mxu2 %v142_v15  ;;  %v157_v49 = vld.sshfl [vmem:[#allocation1 + $0x28] sm:$0xff pattern:$0x73625140]  ;;  %v317_v50 = vld [vmem:[%s633_s3 + $0x40] sm:$0xff]  ;;  %v316_v51 = vld [vmem:[%s633_s3 + $0x38] sm:$0xff] }
  0x2d   :  { %251 = vmatpush.msrb.mxu0 %v121_v5  ;;  %244 = vmatmul.f32.vlgmr.msra.gmra.mxu3 %v155_v19  ;;  %v315_v52 = vld [vmem:[%s633_s3 + $0x30] sm:$0xff]  ;;  %v314_v53 = vld [vmem:[%s633_s3 + $0x28] sm:$0xff]  ;;  %v313_v54 = vld [vmem:[%s633_s3 + $0x20] sm:$0xff] }
  0x2e   :  { %271 = vmatpush.msrb.mxu1 %v137_v6  ;;  %184 = vmatmul.f32.vlgmr.msra.gmra.mxu0 %v152_v16  ;;  %v312_v55 = vld [vmem:[%s633_s3 + $0x18] sm:$0xff]  ;;  %v311_v56 = vld [vmem:[%s633_s3 + $0x10] sm:$0xff]  ;;  %v310_v57 = vld [vmem:[%s633_s3 + $0x8] sm:$0xff] }
  0x2f   :  { %252 = vmatpush.msrb.mxu0 %v120_v9  ;;  %204 = vmatmul.f32.vlgmr.msra.gmra.mxu1 %v153_v20  ;;  %v309_v58 = vld [vmem:[%s633_s3] sm:$0xff]  ;;  %v365_v59 = vld [vmem:[%s635_s5 + $0x78] sm:$0xff]  ;;  %v364_v60 = vld [vmem:[%s635_s5 + $0x70] sm:$0xff] }
  0x30   :  { %272 = vmatpush.msrb.mxu1 %v136_v10  ;;  %303 = vmatpush.msrb.mxu2 %v141_v23  ;;  %v363_v61 = vld [vmem:[%s635_s5 + $0x68] sm:$0xff]  ;;  %v414_v62 = vld [vmem:[%s632_s2] ss:$0 sm:$0xff]  ;;  %v361_v1 = vld [vmem:[%s635_s5 + $0x58] sm:$0xff]  ;;  %s399_s2 = sshll.u32 %s637_s7, 4  ;;  %s400_s2 = int_to_ptr.hbm [resolvable:$true] %s399_s2 }
  0x31   :  { %253 = vmatpush.msrb.mxu0 %v119_v13  ;;  %329 = vmatpush.msrb.mxu3 %v324_v24  ;;  %v362_v63 = vld [vmem:[%s635_s5 + $0x60] sm:$0xff]  ;;  %v360_v3 = vld [vmem:[%s635_s5 + $0x50] sm:$0xff]  ;;  %v359_v5 = vld [vmem:[%s635_s5 + $0x48] sm:$0xff] }
  0x32   :  { %273 = vmatpush.msrb.mxu1 %v135_v14  ;;  %409 = vmatmul.msk.f32.vlgmr.msrb.gmra.mxu2 %vm165_vm0, %v158_v27  ;;  %v358_v7 = vld [vmem:[%s635_s5 + $0x40] sm:$0xff]  ;;  %v357_v9 = vld [vmem:[%s635_s5 + $0x38] sm:$0xff]  ;;  %v356_v11 = vld [vmem:[%s635_s5 + $0x30] sm:$0xff] }
  0x33   :  { %254 = vmatpush.msrb.mxu0 %v118_v17  ;;  %330 = vmatpush.msrb.mxu3 %v323_v28  ;;  %v355_v13 = vld [vmem:[%s635_s5 + $0x28] sm:$0xff]  ;;  %v354_v15 = vld [vmem:[%s635_s5 + $0x20] sm:$0xff]  ;;  %v353_v16 = vld [vmem:[%s635_s5 + $0x18] sm:$0xff] }
  0x34   :  { %274 = vmatpush.msrb.mxu1 %v134_v18  ;;  %370 = vmatpush.msra.mxu2 %v365_v59  ;;  %v352_v24 = vld [vmem:[%s635_s5 + $0x10] sm:$0xff]  ;;  %v415_v27 = vld [vmem:[%s634_s4] ss:$0 sm:$0xff] }
  0x35   :  { %255 = vmatpush.msrb.mxu0 %v117_v21  ;;  %331 = vmatpush.msrb.mxu3 %v322_v31  ;;  %v416_v31 = vld [vmem:[%s636_s6] ss:$0 sm:$0xff] }
  0x36   :  { %275 = vmatpush.msrb.mxu1 %v133_v22  ;;  %371 = vmatpush.msra.mxu2 %v364_v60 }
  0x37   :  { %256 = vmatpush.msrb.mxu0 %v116_v25  ;;  %332 = vmatpush.msrb.mxu3 %v321_v34  ;;  %v351_v25 = vld [vmem:[%s635_s5 + $0x8] sm:$0xff] }
  0x38   :  { %276 = vmatpush.msrb.mxu1 %v132_v26  ;;  %372 = vmatpush.msra.mxu2 %v363_v61  ;;  %v350_v26 = vld [vmem:[%s635_s5] sm:$0xff] }
  0x39   :  { %257 = vmatpush.msrb.mxu0 %v115_v29  ;;  %333 = vmatpush.msrb.mxu3 %v320_v37 }
  0x3a   :  { %277 = vmatpush.msrb.mxu1 %v131_v30  ;;  %373 = vmatpush.msra.mxu2 %v362_v63 }
  0x3b   :  { %258 = vmatpush.msrb.mxu0 %v114_v32  ;;  %334 = vmatpush.msrb.mxu3 %v319_v40 }
  0x3c   :  { %278 = vmatpush.msrb.mxu1 %v130_v33  ;;  %374 = vmatpush.msra.mxu2 %v361_v1 }
  0x3d   :  { %259 = vmatpush.msrb.mxu0 %v113_v35  ;;  %335 = vmatpush.msrb.mxu3 %v318_v43 }
  0x3e   :  { %279 = vmatpush.msrb.mxu1 %v129_v36  ;;  %375 = vmatpush.msra.mxu2 %v360_v3 }
  0x3f   :  { %260 = vmatpush.msrb.mxu0 %v112_v38  ;;  %336 = vmatpush.msrb.mxu3 %v317_v50 }
  0x40   :  { %280 = vmatpush.msrb.mxu1 %v128_v39  ;;  %376 = vmatpush.msra.mxu2 %v359_v5 }
  0x41   :  { %261 = vmatpush.msrb.mxu0 %v111_v41  ;;  %337 = vmatpush.msrb.mxu3 %v316_v51 }
  0x42   :  { %281 = vmatpush.msrb.mxu1 %v127_v42  ;;  %377 = vmatpush.msra.mxu2 %v358_v7 }
  0x43   :  { %262 = vmatpush.msrb.mxu0 %v110_v44  ;;  %338 = vmatpush.msrb.mxu3 %v315_v52 }
  0x44   :  { %282 = vmatpush.msrb.mxu1 %v126_v45  ;;  %378 = vmatpush.msra.mxu2 %v357_v9 }
  0x45   :  { %263 = vmatpush.msrb.mxu0 %v109_v46  ;;  %339 = vmatpush.msrb.mxu3 %v314_v53 }
  0x46   :  { %283 = vmatpush.msrb.mxu1 %v125_v47  ;;  %264 = vmatmul.f32.vlgmr.msrb.gmra.mxu0 %v156_v48 }
  0x47   :  { %284 = vmatmul.f32.vlgmr.msrb.gmra.mxu1 %v157_v49  ;;  %340 = vmatpush.msrb.mxu3 %v313_v54 }
  0x48   :  { %379 = vmatpush.msra.mxu2 %v356_v11 }
  0x49   :  { %341 = vmatpush.msrb.mxu3 %v312_v55 }
  0x4a   :  { %380 = vmatpush.msra.mxu2 %v355_v13 }
  0x4b   :  { %342 = vmatpush.msrb.mxu3 %v311_v56 }
  0x4c   :  { %381 = vmatpush.msra.mxu2 %v354_v15 }
  0x4d   :  { %343 = vmatpush.msrb.mxu3 %v310_v57 }
  0x4e   :  { %382 = vmatpush.msra.mxu2 %v353_v16 }
  0x4f   :  { %344 = vmatpush.msrb.mxu3 %v309_v58 }
  0x50   :  { %383 = vmatpush.msra.mxu2 %v352_v24 }
  0x52   :  { %384 = vmatpush.msra.mxu2 %v351_v25 }
  0x54   :  { %385 = vmatpush.msra.mxu2 %v350_v26 }
  0xab   :  { %v185_v0 = vpop.f32.mrf.mxu0 }
  0xac   :  { %v186_v2 = vadd.f32 %v414_v62, %v185_v0  ;;  %v205_v4 = vpop.f32.mrf.mxu1 }
  0xad   :  { %v225_v8 = vpop.f32.mrf.mxu2 }
  0xae   :  { %v206_v6 = vadd.f32 %v205_v4, %v186_v2 }
  0xb0   :  { %v226_v10 = vadd.f32 %v225_v8, %v206_v6  ;;  %v245_v12 = vpop.f32.mrf.mxu3 }
  0xb2   :  { %v246_v14 = vadd.f32 %v245_v12, %v226_v10 }
  0xb5   :  { %v305_v20 = vpop.f32.mrf.mxu2 }
  0xc3   :  { %v265_v17 = vpop.f32.mrf.mxu0 }
  0xc4   :  { %v285_v18 = vpop.f32.mrf.mxu1  ;;  %v266_v19 = vadd.f32 %v265_v17, %v246_v14 }
  0xc6   :  { %v286_v21 = vadd.f32 %v285_v18, %v266_v19 }
  0xc8   :  { %v306_v22 = vadd.f32 %v305_v20, %v286_v21 }
  0xca   :  { %v308_v23 = vmax.f32 %v306_v22, 0.0 }
  0xcc   :  { %345 = vmatmul.f32.vlgmr.msrb.gmra.mxu3 %v308_v23 }
 0x14f   :  { %v346_v28 = vpop.f32.mrf.mxu3 }
 0x150   :  { %v347_v29 = vadd.f32 %v415_v27, %v346_v28 }
 0x152   :  { %v349_v30 = vmax.f32 %v347_v29, 0.0 }
 0x154   :  { %386 = vmatmul.f32.vlgmr.msra.gmra.mxu2 %v349_v30 }
 0x1d7   :  { %v387_v32 = vpop.f32.mrf.mxu2 }
 0x1d8   :  { %v388_v33 = vadd.f32 %v416_v31, %v387_v32 }
 0x1da   :  { %391 = vst.msk [vmem:[#allocation5] sm:$0x3] %vm390_vm1, %v388_v33 }
 0x1db   :  { %402 = dma.vmem_to_hbm [thread:$0]  %s398_s28, 32, %s400_s2, [#allocation4]  }
 0x1dc   :  { %467 = dma.done.wait [#allocation4], 32  }
 0x1dd   :  { %468 = vsyncadd [#allocation4], 4294967264 }
 0x1de   :  { %407 = vsyncpa [#allocation3], 1 }
 0x1df   :  { %408 = vsyncpa [#allocation4], 1 }

</bundles_post_ra>
